<compile_context>
chip_gen: v5e
topology: v5e:2x2
jax: 0.10.0
libtpu: 0.0.40
codegen_flags: <defaults>
</compile_context>

<pallas_src>
import functools

import jax
import jax.numpy as jnp
from jax.experimental import pallas as pl
from jax.experimental.pallas import tpu as pltpu


def _round_up(x, m):
    return ((x + m - 1) // m) * m


def _layer_matmul(h, w):
    """Feature-major layer: w @ h with f32 accumulation.

    h: (in_f, tile_b) f32, w: (out_f, in_f).
    Tiny contraction dims / tiny output-row counts are computed as VPU
    broadcast multiply-adds (avoids degenerate MXU passes); everything else
    goes through the MXU with N = tile_b.
    """
    out_f, in_f = w.shape
    if in_f <= 8 or (out_f < 8 and in_f <= 128):
        acc = w[:, 0:1].astype(jnp.float32) * h[0:1, :]
        for k in range(1, in_f):
            acc = acc + w[:, k:k + 1].astype(jnp.float32) * h[k:k + 1, :]
        return acc
    # Weights are already in compute_dtype (cast once in the wrapper).
    return jnp.dot(w, h.astype(w.dtype), preferred_element_type=jnp.float32)


def _mlp_kernel(n_layers, *refs):
    # refs = (x_ref, w0, b0, w1, b1, ..., w_{L-1}, b_{L-1}, out_ref)
    x_ref = refs[0]
    out_ref = refs[-1]
    params = refs[1:-1]

    h = x_ref[...].astype(jnp.float32)            # (in_dim, tile_b), batch on lanes
    for i in range(n_layers):
        w = params[2 * i][...]
        b = params[2 * i + 1][...].astype(jnp.float32)   # (out_f, 1)
        h = _layer_matmul(h, w) + b               # bias broadcast over lanes (f32 VPU)
        if i < n_layers - 1:                      # hidden layers: Tanh on full lanes (EUP)
            h = jnp.tanh(h)
    out_ref[...] = h.astype(out_ref.dtype)        # lane-dense store


def _pick_tile_b(batch, dims, param_bytes, budget_bytes=16 * 1024 * 1024):
    """Largest batch tile (<=8192 rows, multiple of 128) whose double-buffered
    x/out blocks + resident params + f32 intermediates fit a conservative,
    generation-safe VMEM budget (v5e default scoped = 16 MiB, v7x physical = 64 MiB)."""
    per_row = 4 * (3 * dims[0] + 3 * dims[-1] + 2 * sum(dims[1:-1]))
    max_rows = max(128, (budget_bytes - param_bytes) // max(per_row, 1))
    tile = min(8192, int(max_rows), _round_up(batch, 128))
    return max(128, (tile // 128) * 128)


def mlp_forward(x, weights, biases, *, compute_dtype=jnp.float32):
    """Run the fused MLP kernel.

    x:       [batch, layers[0]]
    weights: list of [layers[i+1], layers[i]]   (PyTorch [out, in] layout)
    biases:  list of [layers[i+1], 1]
    returns: [batch, layers[-1]] float32
    """
    n_layers = len(weights)
    batch, in_dim = x.shape
    out_dim = weights[-1].shape[0]
    dims = [in_dim] + [w.shape[0] for w in weights]

    # Cast weights once here (not per grid step). Biases stay f32.
    if compute_dtype != jnp.float32:
        weights = [w.astype(compute_dtype) for w in weights]

    flat_params = []
    for w, b in zip(weights, biases):
        flat_params += [w, b]
    param_bytes = sum(int(p.size) * p.dtype.itemsize for p in flat_params)

    # ---- batch tiling: grid over batch, pad batch to a tile multiple ----
    tile_b = _pick_tile_b(batch, dims, param_bytes)
    batch_p = _round_up(batch, tile_b)

    # Feature-major input: batch lives on the lane axis inside the kernel.
    x_t = jnp.zeros((in_dim, batch_p), x.dtype).at[:, :batch].set(x.T)

    grid = (batch_p // tile_b,)
    in_specs = [pl.BlockSpec((in_dim, tile_b), lambda i: (0, i))]
    # Weights/biases: full-array blocks, constant index_map -> VMEM-resident
    # across all grid steps.
    in_specs += [pl.BlockSpec(p.shape, lambda i: (0, 0)) for p in flat_params]
    out_specs = pl.BlockSpec((out_dim, tile_b), lambda i: (0, i))

    per_row_vmem = 4 * (3 * dims[0] + 3 * dims[-1] + 2 * sum(dims[1:-1]))
    vmem_needed = param_bytes + per_row_vmem * tile_b + (2 << 20)
    vmem_limit = int(min(32 << 20, max(16 << 20, vmem_needed)))

    flops = 2 * batch_p * sum(w.shape[0] * w.shape[1] for w in weights)
    transcendentals = batch_p * sum(w.shape[0] for w in weights[:-1])
    bytes_accessed = 4 * batch_p * (in_dim + out_dim) + param_bytes

    kernel = functools.partial(_mlp_kernel, n_layers)
    out = pl.pallas_call(
        kernel,
        out_shape=jax.ShapeDtypeStruct((out_dim, batch_p), jnp.float32),
        grid=grid,
        in_specs=in_specs,
        out_specs=out_specs,
        compiler_params=pltpu.CompilerParams(
            dimension_semantics=("parallel",),      # both v7x TCs split the tiles
            vmem_limit_bytes=vmem_limit),
        cost_estimate=pl.CostEstimate(
            flops=int(flops),
            transcendentals=int(transcendentals),
            bytes_accessed=int(bytes_accessed)),
    )(x_t, *flat_params)

    return out[:, :batch].T


def init_params(layers, key):
    """Deterministic init mimicking torch.nn.Linear defaults:
    U(-1/sqrt(fan_in), 1/sqrt(fan_in)) for both weight and bias.
    Weights stored in PyTorch [out, in] layout; biases as [out, 1]."""
    weights, biases = [], []
    for i in range(len(layers) - 1):
        fan_in, fan_out = layers[i], layers[i + 1]
        key, kw, kb = jax.random.split(key, 3)
        bound = 1.0 / jnp.sqrt(fan_in)
        w = jax.random.uniform(kw, (fan_out, fan_in), jnp.float32, -bound, bound)
        b = jax.random.uniform(kb, (fan_out, 1), jnp.float32, -bound, bound)
        weights.append(w)
        biases.append(b)
    return weights, biases


def mlp_reference(x, weights, biases):
    """Pure-JAX reference matching the PyTorch NN.forward."""
    h = x
    for i, (w, b) in enumerate(zip(weights, biases)):
        h = h @ w.T + b[:, 0]
        if i < len(weights) - 1:
            h = jnp.tanh(h)
    return h


if __name__ == "__main__":
    key = jax.random.PRNGKey(0)
    key, kx = jax.random.split(key)

    # NN(layers=[4, 32, 32, 1]): two Tanh hidden layers + final linear layer.
    layers = [4, 32, 32, 1]
    batch = 8

    x = jax.random.normal(kx, (batch, layers[0]), jnp.float32)
    weights, biases = init_params(layers, key)

    # f32 path, single tile.
    out = jax.block_until_ready(mlp_forward(x, weights, biases))
    ref = mlp_reference(x, weights, biases)
    assert out.shape == (batch, layers[-1])
    assert jnp.allclose(out, ref, atol=2e-5, rtol=2e-5), "f32 mismatch vs reference"

    # Non-tile-multiple batch: exercises batch padding + tile sizing.
    key, kx2 = jax.random.split(key)
    x2 = jax.random.normal(kx2, (1000, layers[0]), jnp.float32)
    out2 = jax.block_until_ready(mlp_forward(x2, weights, biases))
    ref2 = mlp_reference(x2, weights, biases)
    assert out2.shape == (1000, layers[-1])
    assert jnp.allclose(out2, ref2, atol=2e-5, rtol=2e-5), "tiled f32 mismatch"

    # Optional bf16 MXU-operand path (not the default; f32 recommended on v5e).
    out_bf16 = jax.block_until_ready(
        mlp_forward(x2, weights, biases, compute_dtype=jnp.bfloat16))
    assert jnp.allclose(out_bf16, ref2, atol=5e-2, rtol=5e-2), "bf16 mismatch"

    print("KERNEL_OK")
</pallas_src>

<mosaic_0001>
module attributes {stable_mosaic.version = 11 : i64} {
  func.func @_mlp_kernel(%arg0: i32, %arg1: memref<4x128xf32, #tpu.memory_space<vmem>>, %arg2: memref<32x4xf32, #tpu.memory_space<vmem>>, %arg3: memref<32x1xf32, #tpu.memory_space<vmem>>, %arg4: memref<32x32xf32, #tpu.memory_space<vmem>>, %arg5: memref<32x1xf32, #tpu.memory_space<vmem>>, %arg6: memref<1x32xf32, #tpu.memory_space<vmem>>, %arg7: memref<1x1xf32, #tpu.memory_space<vmem>>, %arg8: memref<1x128xf32, #tpu.memory_space<vmem>>) attributes {dimension_semantics = [#tpu.dimension_semantics<parallel>], iteration_bounds = array<i64: 1>, scalar_prefetch = 0 : i64, scratch_operands = 0 : i64, tpu.core_type = #tpu.core_type<tc>, window_params = [{transform_indices = @transform_0, window_bounds = array<i64: 4, 128>}, {pipeline_mode = #tpu.pipeline_mode<synchronous>, transform_indices = @transform_1, window_bounds = array<i64: 32, 4>}, {pipeline_mode = #tpu.pipeline_mode<synchronous>, transform_indices = @transform_2, window_bounds = array<i64: 32, 1>}, {pipeline_mode = #tpu.pipeline_mode<synchronous>, transform_indices = @transform_3, window_bounds = array<i64: 32, 32>}, {pipeline_mode = #tpu.pipeline_mode<synchronous>, transform_indices = @transform_4, window_bounds = array<i64: 32, 1>}, {pipeline_mode = #tpu.pipeline_mode<synchronous>, transform_indices = @transform_5, window_bounds = array<i64: 1, 32>}, {pipeline_mode = #tpu.pipeline_mode<synchronous>, transform_indices = @transform_6, window_bounds = array<i64: 1, 1>}, {transform_indices = @transform_7, window_bounds = array<i64: 1, 128>}]} {
    %c0 = arith.constant 0 : index
    %c0_0 = arith.constant 0 : index
    %0 = vector.load %arg1[%c0, %c0_0] : memref<4x128xf32, #tpu.memory_space<vmem>>, vector<4x128xf32>
    %c0_1 = arith.constant 0 : index
    %c0_2 = arith.constant 0 : index
    %1 = vector.load %arg2[%c0_1, %c0_2] : memref<32x4xf32, #tpu.memory_space<vmem>>, vector<32x4xf32>
    %c0_3 = arith.constant 0 : index
    %c0_4 = arith.constant 0 : index
    %2 = vector.load %arg3[%c0_3, %c0_4] : memref<32x1xf32, #tpu.memory_space<vmem>>, vector<32x1xf32>
    %3 = vector.extract_strided_slice %1 {offsets = [0, 0], sizes = [32, 1], strides = [1, 1]} : vector<32x4xf32> to vector<32x1xf32>
    %4 = vector.extract_strided_slice %0 {offsets = [0, 0], sizes = [1, 128], strides = [1, 1]} : vector<4x128xf32> to vector<1x128xf32>
    %5 = vector.broadcast %3 : vector<32x1xf32> to vector<32x128xf32>
    %6 = vector.broadcast %4 : vector<1x128xf32> to vector<32x128xf32>
    %7 = arith.mulf %5, %6 : vector<32x128xf32>
    %8 = vector.extract_strided_slice %1 {offsets = [0, 1], sizes = [32, 1], strides = [1, 1]} : vector<32x4xf32> to vector<32x1xf32>
    %9 = vector.extract_strided_slice %0 {offsets = [1, 0], sizes = [1, 128], strides = [1, 1]} : vector<4x128xf32> to vector<1x128xf32>
    %10 = vector.broadcast %8 : vector<32x1xf32> to vector<32x128xf32>
    %11 = vector.broadcast %9 : vector<1x128xf32> to vector<32x128xf32>
    %12 = arith.mulf %10, %11 : vector<32x128xf32>
    %13 = arith.addf %7, %12 : vector<32x128xf32>
    %14 = vector.extract_strided_slice %1 {offsets = [0, 2], sizes = [32, 1], strides = [1, 1]} : vector<32x4xf32> to vector<32x1xf32>
    %15 = vector.extract_strided_slice %0 {offsets = [2, 0], sizes = [1, 128], strides = [1, 1]} : vector<4x128xf32> to vector<1x128xf32>
    %16 = vector.broadcast %14 : vector<32x1xf32> to vector<32x128xf32>
    %17 = vector.broadcast %15 : vector<1x128xf32> to vector<32x128xf32>
    %18 = arith.mulf %16, %17 : vector<32x128xf32>
    %19 = arith.addf %13, %18 : vector<32x128xf32>
    %20 = vector.extract_strided_slice %1 {offsets = [0, 3], sizes = [32, 1], strides = [1, 1]} : vector<32x4xf32> to vector<32x1xf32>
    %21 = vector.extract_strided_slice %0 {offsets = [3, 0], sizes = [1, 128], strides = [1, 1]} : vector<4x128xf32> to vector<1x128xf32>
    %22 = vector.broadcast %20 : vector<32x1xf32> to vector<32x128xf32>
    %23 = vector.broadcast %21 : vector<1x128xf32> to vector<32x128xf32>
    %24 = arith.mulf %22, %23 : vector<32x128xf32>
    %25 = arith.addf %19, %24 : vector<32x128xf32>
    %26 = vector.broadcast %2 : vector<32x1xf32> to vector<32x128xf32>
    %27 = arith.addf %25, %26 : vector<32x128xf32>
    %28 = math.tanh %27 : vector<32x128xf32>
    %c0_5 = arith.constant 0 : index
    %c0_6 = arith.constant 0 : index
    %29 = vector.load %arg4[%c0_5, %c0_6] : memref<32x32xf32, #tpu.memory_space<vmem>>, vector<32x32xf32>
    %c0_7 = arith.constant 0 : index
    %c0_8 = arith.constant 0 : index
    %30 = vector.load %arg5[%c0_7, %c0_8] : memref<32x1xf32, #tpu.memory_space<vmem>>, vector<32x1xf32>
    %cst = arith.constant dense<0.000000e+00> : vector<32x128xf32>
    %31 = tpu.matmul %29, %28, %cst {dimension_numbers = #tpu.dot_dimension_numbers<[1], [0], [0], [1], [0, 0, 1, 1], [], []>} : vector<32x32xf32>, vector<32x128xf32>, vector<32x128xf32> -> vector<32x128xf32>
    %32 = vector.broadcast %30 : vector<32x1xf32> to vector<32x128xf32>
    %33 = arith.addf %31, %32 : vector<32x128xf32>
    %34 = math.tanh %33 : vector<32x128xf32>
    %c0_9 = arith.constant 0 : index
    %c0_10 = arith.constant 0 : index
    %35 = vector.load %arg6[%c0_9, %c0_10] : memref<1x32xf32, #tpu.memory_space<vmem>>, vector<1x32xf32>
    %c0_11 = arith.constant 0 : index
    %c0_12 = arith.constant 0 : index
    %36 = vector.load %arg7[%c0_11, %c0_12] : memref<1x1xf32, #tpu.memory_space<vmem>>, vector<1x1xf32>
    %37 = vector.extract_strided_slice %35 {offsets = [0, 0], sizes = [1, 1], strides = [1, 1]} : vector<1x32xf32> to vector<1x1xf32>
    %38 = vector.extract_strided_slice %34 {offsets = [0, 0], sizes = [1, 128], strides = [1, 1]} : vector<32x128xf32> to vector<1x128xf32>
    %39 = vector.broadcast %37 : vector<1x1xf32> to vector<1x128xf32>
    %40 = arith.mulf %39, %38 : vector<1x128xf32>
    %41 = vector.extract_strided_slice %35 {offsets = [0, 1], sizes = [1, 1], strides = [1, 1]} : vector<1x32xf32> to vector<1x1xf32>
    %42 = vector.extract_strided_slice %34 {offsets = [1, 0], sizes = [1, 128], strides = [1, 1]} : vector<32x128xf32> to vector<1x128xf32>
    %43 = vector.broadcast %41 : vector<1x1xf32> to vector<1x128xf32>
    %44 = arith.mulf %43, %42 : vector<1x128xf32>
    %45 = arith.addf %40, %44 : vector<1x128xf32>
    %46 = vector.extract_strided_slice %35 {offsets = [0, 2], sizes = [1, 1], strides = [1, 1]} : vector<1x32xf32> to vector<1x1xf32>
    %47 = vector.extract_strided_slice %34 {offsets = [2, 0], sizes = [1, 128], strides = [1, 1]} : vector<32x128xf32> to vector<1x128xf32>
    %48 = vector.broadcast %46 : vector<1x1xf32> to vector<1x128xf32>
    %49 = arith.mulf %48, %47 : vector<1x128xf32>
    %50 = arith.addf %45, %49 : vector<1x128xf32>
    %51 = vector.extract_strided_slice %35 {offsets = [0, 3], sizes = [1, 1], strides = [1, 1]} : vector<1x32xf32> to vector<1x1xf32>
    %52 = vector.extract_strided_slice %34 {offsets = [3, 0], sizes = [1, 128], strides = [1, 1]} : vector<32x128xf32> to vector<1x128xf32>
    %53 = vector.broadcast %51 : vector<1x1xf32> to vector<1x128xf32>
    %54 = arith.mulf %53, %52 : vector<1x128xf32>
    %55 = arith.addf %50, %54 : vector<1x128xf32>
    %56 = vector.extract_strided_slice %35 {offsets = [0, 4], sizes = [1, 1], strides = [1, 1]} : vector<1x32xf32> to vector<1x1xf32>
    %57 = vector.extract_strided_slice %34 {offsets = [4, 0], sizes = [1, 128], strides = [1, 1]} : vector<32x128xf32> to vector<1x128xf32>
    %58 = vector.broadcast %56 : vector<1x1xf32> to vector<1x128xf32>
    %59 = arith.mulf %58, %57 : vector<1x128xf32>
    %60 = arith.addf %55, %59 : vector<1x128xf32>
    %61 = vector.extract_strided_slice %35 {offsets = [0, 5], sizes = [1, 1], strides = [1, 1]} : vector<1x32xf32> to vector<1x1xf32>
    %62 = vector.extract_strided_slice %34 {offsets = [5, 0], sizes = [1, 128], strides = [1, 1]} : vector<32x128xf32> to vector<1x128xf32>
    %63 = vector.broadcast %61 : vector<1x1xf32> to vector<1x128xf32>
    %64 = arith.mulf %63, %62 : vector<1x128xf32>
    %65 = arith.addf %60, %64 : vector<1x128xf32>
    %66 = vector.extract_strided_slice %35 {offsets = [0, 6], sizes = [1, 1], strides = [1, 1]} : vector<1x32xf32> to vector<1x1xf32>
    %67 = vector.extract_strided_slice %34 {offsets = [6, 0], sizes = [1, 128], strides = [1, 1]} : vector<32x128xf32> to vector<1x128xf32>
    %68 = vector.broadcast %66 : vector<1x1xf32> to vector<1x128xf32>
    %69 = arith.mulf %68, %67 : vector<1x128xf32>
    %70 = arith.addf %65, %69 : vector<1x128xf32>
    %71 = vector.extract_strided_slice %35 {offsets = [0, 7], sizes = [1, 1], strides = [1, 1]} : vector<1x32xf32> to vector<1x1xf32>
    %72 = vector.extract_strided_slice %34 {offsets = [7, 0], sizes = [1, 128], strides = [1, 1]} : vector<32x128xf32> to vector<1x128xf32>
    %73 = vector.broadcast %71 : vector<1x1xf32> to vector<1x128xf32>
    %74 = arith.mulf %73, %72 : vector<1x128xf32>
    %75 = arith.addf %70, %74 : vector<1x128xf32>
    %76 = vector.extract_strided_slice %35 {offsets = [0, 8], sizes = [1, 1], strides = [1, 1]} : vector<1x32xf32> to vector<1x1xf32>
    %77 = vector.extract_strided_slice %34 {offsets = [8, 0], sizes = [1, 128], strides = [1, 1]} : vector<32x128xf32> to vector<1x128xf32>
    %78 = vector.broadcast %76 : vector<1x1xf32> to vector<1x128xf32>
    %79 = arith.mulf %78, %77 : vector<1x128xf32>
    %80 = arith.addf %75, %79 : vector<1x128xf32>
    %81 = vector.extract_strided_slice %35 {offsets = [0, 9], sizes = [1, 1], strides = [1, 1]} : vector<1x32xf32> to vector<1x1xf32>
    %82 = vector.extract_strided_slice %34 {offsets = [9, 0], sizes = [1, 128], strides = [1, 1]} : vector<32x128xf32> to vector<1x128xf32>
    %83 = vector.broadcast %81 : vector<1x1xf32> to vector<1x128xf32>
    %84 = arith.mulf %83, %82 : vector<1x128xf32>
    %85 = arith.addf %80, %84 : vector<1x128xf32>
    %86 = vector.extract_strided_slice %35 {offsets = [0, 10], sizes = [1, 1], strides = [1, 1]} : vector<1x32xf32> to vector<1x1xf32>
    %87 = vector.extract_strided_slice %34 {offsets = [10, 0], sizes = [1, 128], strides = [1, 1]} : vector<32x128xf32> to vector<1x128xf32>
    %88 = vector.broadcast %86 : vector<1x1xf32> to vector<1x128xf32>
    %89 = arith.mulf %88, %87 : vector<1x128xf32>
    %90 = arith.addf %85, %89 : vector<1x128xf32>
    %91 = vector.extract_strided_slice %35 {offsets = [0, 11], sizes = [1, 1], strides = [1, 1]} : vector<1x32xf32> to vector<1x1xf32>
    %92 = vector.extract_strided_slice %34 {offsets = [11, 0], sizes = [1, 128], strides = [1, 1]} : vector<32x128xf32> to vector<1x128xf32>
    %93 = vector.broadcast %91 : vector<1x1xf32> to vector<1x128xf32>
    %94 = arith.mulf %93, %92 : vector<1x128xf32>
    %95 = arith.addf %90, %94 : vector<1x128xf32>
    %96 = vector.extract_strided_slice %35 {offsets = [0, 12], sizes = [1, 1], strides = [1, 1]} : vector<1x32xf32> to vector<1x1xf32>
    %97 = vector.extract_strided_slice %34 {offsets = [12, 0], sizes = [1, 128], strides = [1, 1]} : vector<32x128xf32> to vector<1x128xf32>
    %98 = vector.broadcast %96 : vector<1x1xf32> to vector<1x128xf32>
    %99 = arith.mulf %98, %97 : vector<1x128xf32>
    %100 = arith.addf %95, %99 : vector<1x128xf32>
    %101 = vector.extract_strided_slice %35 {offsets = [0, 13], sizes = [1, 1], strides = [1, 1]} : vector<1x32xf32> to vector<1x1xf32>
    %102 = vector.extract_strided_slice %34 {offsets = [13, 0], sizes = [1, 128], strides = [1, 1]} : vector<32x128xf32> to vector<1x128xf32>
    %103 = vector.broadcast %101 : vector<1x1xf32> to vector<1x128xf32>
    %104 = arith.mulf %103, %102 : vector<1x128xf32>
    %105 = arith.addf %100, %104 : vector<1x128xf32>
    %106 = vector.extract_strided_slice %35 {offsets = [0, 14], sizes = [1, 1], strides = [1, 1]} : vector<1x32xf32> to vector<1x1xf32>
    %107 = vector.extract_strided_slice %34 {offsets = [14, 0], sizes = [1, 128], strides = [1, 1]} : vector<32x128xf32> to vector<1x128xf32>
    %108 = vector.broadcast %106 : vector<1x1xf32> to vector<1x128xf32>
    %109 = arith.mulf %108, %107 : vector<1x128xf32>
    %110 = arith.addf %105, %109 : vector<1x128xf32>
    %111 = vector.extract_strided_slice %35 {offsets = [0, 15], sizes = [1, 1], strides = [1, 1]} : vector<1x32xf32> to vector<1x1xf32>
    %112 = vector.extract_strided_slice %34 {offsets = [15, 0], sizes = [1, 128], strides = [1, 1]} : vector<32x128xf32> to vector<1x128xf32>
    %113 = vector.broadcast %111 : vector<1x1xf32> to vector<1x128xf32>
    %114 = arith.mulf %113, %112 : vector<1x128xf32>
    %115 = arith.addf %110, %114 : vector<1x128xf32>
    %116 = vector.extract_strided_slice %35 {offsets = [0, 16], sizes = [1, 1], strides = [1, 1]} : vector<1x32xf32> to vector<1x1xf32>
    %117 = vector.extract_strided_slice %34 {offsets = [16, 0], sizes = [1, 128], strides = [1, 1]} : vector<32x128xf32> to vector<1x128xf32>
    %118 = vector.broadcast %116 : vector<1x1xf32> to vector<1x128xf32>
    %119 = arith.mulf %118, %117 : vector<1x128xf32>
    %120 = arith.addf %115, %119 : vector<1x128xf32>
    %121 = vector.extract_strided_slice %35 {offsets = [0, 17], sizes = [1, 1], strides = [1, 1]} : vector<1x32xf32> to vector<1x1xf32>
    %122 = vector.extract_strided_slice %34 {offsets = [17, 0], sizes = [1, 128], strides = [1, 1]} : vector<32x128xf32> to vector<1x128xf32>
    %123 = vector.broadcast %121 : vector<1x1xf32> to vector<1x128xf32>
    %124 = arith.mulf %123, %122 : vector<1x128xf32>
    %125 = arith.addf %120, %124 : vector<1x128xf32>
    %126 = vector.extract_strided_slice %35 {offsets = [0, 18], sizes = [1, 1], strides = [1, 1]} : vector<1x32xf32> to vector<1x1xf32>
    %127 = vector.extract_strided_slice %34 {offsets = [18, 0], sizes = [1, 128], strides = [1, 1]} : vector<32x128xf32> to vector<1x128xf32>
    %128 = vector.broadcast %126 : vector<1x1xf32> to vector<1x128xf32>
    %129 = arith.mulf %128, %127 : vector<1x128xf32>
    %130 = arith.addf %125, %129 : vector<1x128xf32>
    %131 = vector.extract_strided_slice %35 {offsets = [0, 19], sizes = [1, 1], strides = [1, 1]} : vector<1x32xf32> to vector<1x1xf32>
    %132 = vector.extract_strided_slice %34 {offsets = [19, 0], sizes = [1, 128], strides = [1, 1]} : vector<32x128xf32> to vector<1x128xf32>
    %133 = vector.broadcast %131 : vector<1x1xf32> to vector<1x128xf32>
    %134 = arith.mulf %133, %132 : vector<1x128xf32>
    %135 = arith.addf %130, %134 : vector<1x128xf32>
    %136 = vector.extract_strided_slice %35 {offsets = [0, 20], sizes = [1, 1], strides = [1, 1]} : vector<1x32xf32> to vector<1x1xf32>
    %137 = vector.extract_strided_slice %34 {offsets = [20, 0], sizes = [1, 128], strides = [1, 1]} : vector<32x128xf32> to vector<1x128xf32>
    %138 = vector.broadcast %136 : vector<1x1xf32> to vector<1x128xf32>
    %139 = arith.mulf %138, %137 : vector<1x128xf32>
    %140 = arith.addf %135, %139 : vector<1x128xf32>
    %141 = vector.extract_strided_slice %35 {offsets = [0, 21], sizes = [1, 1], strides = [1, 1]} : vector<1x32xf32> to vector<1x1xf32>
    %142 = vector.extract_strided_slice %34 {offsets = [21, 0], sizes = [1, 128], strides = [1, 1]} : vector<32x128xf32> to vector<1x128xf32>
    %143 = vector.broadcast %141 : vector<1x1xf32> to vector<1x128xf32>
    %144 = arith.mulf %143, %142 : vector<1x128xf32>
    %145 = arith.addf %140, %144 : vector<1x128xf32>
    %146 = vector.extract_strided_slice %35 {offsets = [0, 22], sizes = [1, 1], strides = [1, 1]} : vector<1x32xf32> to vector<1x1xf32>
    %147 = vector.extract_strided_slice %34 {offsets = [22, 0], sizes = [1, 128], strides = [1, 1]} : vector<32x128xf32> to vector<1x128xf32>
    %148 = vector.broadcast %146 : vector<1x1xf32> to vector<1x128xf32>
    %149 = arith.mulf %148, %147 : vector<1x128xf32>
    %150 = arith.addf %145, %149 : vector<1x128xf32>
    %151 = vector.extract_strided_slice %35 {offsets = [0, 23], sizes = [1, 1], strides = [1, 1]} : vector<1x32xf32> to vector<1x1xf32>
    %152 = vector.extract_strided_slice %34 {offsets = [23, 0], sizes = [1, 128], strides = [1, 1]} : vector<32x128xf32> to vector<1x128xf32>
    %153 = vector.broadcast %151 : vector<1x1xf32> to vector<1x128xf32>
    %154 = arith.mulf %153, %152 : vector<1x128xf32>
    %155 = arith.addf %150, %154 : vector<1x128xf32>
    %156 = vector.extract_strided_slice %35 {offsets = [0, 24], sizes = [1, 1], strides = [1, 1]} : vector<1x32xf32> to vector<1x1xf32>
    %157 = vector.extract_strided_slice %34 {offsets = [24, 0], sizes = [1, 128], strides = [1, 1]} : vector<32x128xf32> to vector<1x128xf32>
    %158 = vector.broadcast %156 : vector<1x1xf32> to vector<1x128xf32>
    %159 = arith.mulf %158, %157 : vector<1x128xf32>
    %160 = arith.addf %155, %159 : vector<1x128xf32>
    %161 = vector.extract_strided_slice %35 {offsets = [0, 25], sizes = [1, 1], strides = [1, 1]} : vector<1x32xf32> to vector<1x1xf32>
    %162 = vector.extract_strided_slice %34 {offsets = [25, 0], sizes = [1, 128], strides = [1, 1]} : vector<32x128xf32> to vector<1x128xf32>
    %163 = vector.broadcast %161 : vector<1x1xf32> to vector<1x128xf32>
    %164 = arith.mulf %163, %162 : vector<1x128xf32>
    %165 = arith.addf %160, %164 : vector<1x128xf32>
    %166 = vector.extract_strided_slice %35 {offsets = [0, 26], sizes = [1, 1], strides = [1, 1]} : vector<1x32xf32> to vector<1x1xf32>
    %167 = vector.extract_strided_slice %34 {offsets = [26, 0], sizes = [1, 128], strides = [1, 1]} : vector<32x128xf32> to vector<1x128xf32>
    %168 = vector.broadcast %166 : vector<1x1xf32> to vector<1x128xf32>
    %169 = arith.mulf %168, %167 : vector<1x128xf32>
    %170 = arith.addf %165, %169 : vector<1x128xf32>
    %171 = vector.extract_strided_slice %35 {offsets = [0, 27], sizes = [1, 1], strides = [1, 1]} : vector<1x32xf32> to vector<1x1xf32>
    %172 = vector.extract_strided_slice %34 {offsets = [27, 0], sizes = [1, 128], strides = [1, 1]} : vector<32x128xf32> to vector<1x128xf32>
    %173 = vector.broadcast %171 : vector<1x1xf32> to vector<1x128xf32>
    %174 = arith.mulf %173, %172 : vector<1x128xf32>
    %175 = arith.addf %170, %174 : vector<1x128xf32>
    %176 = vector.extract_strided_slice %35 {offsets = [0, 28], sizes = [1, 1], strides = [1, 1]} : vector<1x32xf32> to vector<1x1xf32>
    %177 = vector.extract_strided_slice %34 {offsets = [28, 0], sizes = [1, 128], strides = [1, 1]} : vector<32x128xf32> to vector<1x128xf32>
    %178 = vector.broadcast %176 : vector<1x1xf32> to vector<1x128xf32>
    %179 = arith.mulf %178, %177 : vector<1x128xf32>
    %180 = arith.addf %175, %179 : vector<1x128xf32>
    %181 = vector.extract_strided_slice %35 {offsets = [0, 29], sizes = [1, 1], strides = [1, 1]} : vector<1x32xf32> to vector<1x1xf32>
    %182 = vector.extract_strided_slice %34 {offsets = [29, 0], sizes = [1, 128], strides = [1, 1]} : vector<32x128xf32> to vector<1x128xf32>
    %183 = vector.broadcast %181 : vector<1x1xf32> to vector<1x128xf32>
    %184 = arith.mulf %183, %182 : vector<1x128xf32>
    %185 = arith.addf %180, %184 : vector<1x128xf32>
    %186 = vector.extract_strided_slice %35 {offsets = [0, 30], sizes = [1, 1], strides = [1, 1]} : vector<1x32xf32> to vector<1x1xf32>
    %187 = vector.extract_strided_slice %34 {offsets = [30, 0], sizes = [1, 128], strides = [1, 1]} : vector<32x128xf32> to vector<1x128xf32>
    %188 = vector.broadcast %186 : vector<1x1xf32> to vector<1x128xf32>
    %189 = arith.mulf %188, %187 : vector<1x128xf32>
    %190 = arith.addf %185, %189 : vector<1x128xf32>
    %191 = vector.extract_strided_slice %35 {offsets = [0, 31], sizes = [1, 1], strides = [1, 1]} : vector<1x32xf32> to vector<1x1xf32>
    %192 = vector.extract_strided_slice %34 {offsets = [31, 0], sizes = [1, 128], strides = [1, 1]} : vector<32x128xf32> to vector<1x128xf32>
    %193 = vector.broadcast %191 : vector<1x1xf32> to vector<1x128xf32>
    %194 = arith.mulf %193, %192 : vector<1x128xf32>
    %195 = arith.addf %190, %194 : vector<1x128xf32>
    %196 = vector.broadcast %36 : vector<1x1xf32> to vector<1x128xf32>
    %197 = arith.addf %195, %196 : vector<1x128xf32>
    %c0_13 = arith.constant 0 : index
    %c0_14 = arith.constant 0 : index
    %198 = vector.load %arg8[%c0_13, %c0_14] : memref<1x128xf32, #tpu.memory_space<vmem>>, vector<1x128xf32>
    tpu.vector_store %arg8[%c0_13, %c0_14], %197 {strides = array<i32>} : memref<1x128xf32, #tpu.memory_space<vmem>>, vector<1x128xf32>,
    return
  }
  func.func @transform_0(%arg0: i32) -> (i32, i32) {
    %c0_i32 = arith.constant 0 : i32
    %c0_i32_0 = arith.constant 0 : i32
    return %c0_i32, %arg0 : i32, i32
  }
  func.func @transform_1(%arg0: i32) -> (i32, i32) {
    %c0_i32 = arith.constant 0 : i32
    %c0_i32_0 = arith.constant 0 : i32
    %c0_i32_1 = arith.constant 0 : i32
    return %c0_i32, %c0_i32_0 : i32, i32
  }
  func.func @transform_2(%arg0: i32) -> (i32, i32) {
    %c0_i32 = arith.constant 0 : i32
    %c0_i32_0 = arith.constant 0 : i32
    %c0_i32_1 = arith.constant 0 : i32
    return %c0_i32, %c0_i32_0 : i32, i32
  }
  func.func @transform_3(%arg0: i32) -> (i32, i32) {
    %c0_i32 = arith.constant 0 : i32
    %c0_i32_0 = arith.constant 0 : i32
    %c0_i32_1 = arith.constant 0 : i32
    return %c0_i32, %c0_i32_0 : i32, i32
  }
  func.func @transform_4(%arg0: i32) -> (i32, i32) {
    %c0_i32 = arith.constant 0 : i32
    %c0_i32_0 = arith.constant 0 : i32
    %c0_i32_1 = arith.constant 0 : i32
    return %c0_i32, %c0_i32_0 : i32, i32
  }
  func.func @transform_5(%arg0: i32) -> (i32, i32) {
    %c0_i32 = arith.constant 0 : i32
    %c0_i32_0 = arith.constant 0 : i32
    %c0_i32_1 = arith.constant 0 : i32
    return %c0_i32, %c0_i32_0 : i32, i32
  }
  func.func @transform_6(%arg0: i32) -> (i32, i32) {
    %c0_i32 = arith.constant 0 : i32
    %c0_i32_0 = arith.constant 0 : i32
    %c0_i32_1 = arith.constant 0 : i32
    return %c0_i32, %c0_i32_0 : i32, i32
  }
  func.func @transform_7(%arg0: i32) -> (i32, i32) {
    %c0_i32 = arith.constant 0 : i32
    %c0_i32_0 = arith.constant 0 : i32
    return %c0_i32, %arg0 : i32, i32
  }
}

</mosaic_0001>

<bundles_post_ra>
// kernel: tpu_custom_call.1
= control target key start
LH: loop header
LB: loop body
LE: loop exit
PB: predicated region body
PF: predicated region fallthrough
CT: control target
= control target key end

     0   :  { %s925_s0 = inlined_call_operand.vmem [shape: f32[4,128], index: 0, kind: input, shape index: {}]   ;;  %s926_s1 = inlined_call_operand.vmem [shape: f32[32,4], index: 1, kind: input, shape index: {}]   ;;  %s927_s2 = inlined_call_operand.vmem [shape: f32[32,1], index: 2, kind: input, shape index: {}]   ;;  %s928_s3 = inlined_call_operand.vmem [shape: f32[32,32], index: 3, kind: input, shape index: {}]   ;;  %s929_s4 = inlined_call_operand.vmem [shape: f32[32,1], index: 4, kind: input, shape index: {}]   ;;  %s930_s5 = inlined_call_operand.vmem [shape: f32[1,32], index: 5, kind: input, shape index: {}]   ;;  %s931_s6 = inlined_call_operand.<no memory space> [shape: f32[1,1], index: 6, kind: input, shape index: {}]   ;;  %s932_s7 = inlined_call_operand.hbm [shape: f32[1,128], index: 7, kind: output, shape index: {}]  }
   0x1   :  { %v12_v0 = vstv %s931_s6 }
   0x2   :  { %13 = vst [vmem:[#allocation2] sm:$0x1] %v12_v0 }
   0x3   :  { %v32_v1 = vld [vmem:[%s926_s1 + $0x10] sm:$0xff]  ;;  %v30_v2 = vld [vmem:[%s926_s1] sm:$0xff]  ;;  %v710_v3 = vmov 1  }
   0x4   :  { %625 = vset.pattern.permute.xlu0 %v710_v3  ;;  %624 = vset.pattern.permute.xlu2 %v710_v3 }
   0x5   :  { %14 = vsyncpa [#allocation4], 0  ;;  %v711_v4 = vmov 0   ;;  %72 = vperm.xlu0 %625, %v32_v1   ;;  %64 = vperm.xlu2 %624, %v30_v2   ;;  %v33_v5 = vld [vmem:[%s926_s1 + $0x18] sm:$0xff]  ;;  %v31_v6 = vld [vmem:[%s926_s1 + $0x8] sm:$0xff]  ;;  %v712_v7 = vmov 2  }
   0x6   :  { %623 = vset.pattern.permute.xlu1 %v711_v4  ;;  %v37_v8 = vld [vmem:[%s927_s2 + $0x18] sm:$0xff]  ;;  %v713_v9 = vmov 3   ;;  %v171_v10 = vld [vmem:[%s929_s4 + $0x8] sm:$0xff]  ;;  %v809_v11 = vld [vmem:[%s930_s5] sm:$0x1]  ;;  %v714_v18 = vmov 4  }
   0x7   :  { %50 = vperm.xlu1 %623, %v32_v1   ;;  %v35_v12 = vld [vmem:[%s927_s2 + $0x8] sm:$0xff]  ;;  %v36_v13 = vld [vmem:[%s927_s2 + $0x10] sm:$0xff]  ;;  %v170_v14 = vld [vmem:[%s929_s4] sm:$0xff]  ;;  %v715_v19 = vmov 6   ;;  %v716_v20 = vmov 9   ;;  %v717_v22 = vmov 5  }
   0x8   :  { %v34_v15 = vld [vmem:[%s927_s2] sm:$0xff]  ;;  %v173_v16 = vld [vmem:[%s929_s4 + $0x18] sm:$0xff]  ;;  %v172_v17 = vld [vmem:[%s929_s4 + $0x10] sm:$0xff]  ;;  %v718_v23 = vmov 11   ;;  %v719_v26 = vmov 7   ;;  %v720_v29 = vmov 14  }
   0x9   :  { %v721_v32 = vmov 10   ;;  %v722_v34 = vmov 16   ;;  %v723_v36 = vmov 12   ;;  %v724_v39 = vmov 19   ;;  %v29_v41 = vld [vmem:[%s925_s0] sm:$0xf] }
   0xa   :  { %v725_v40 = vmov 8   ;;  %v726_v43 = vmov 15   ;;  %v79_v44 = vperm.slane %v29_v41, 1  ;;  %v727_v46 = vmov 21   ;;  %s565_s1 = sshll.u32 %s932_s7, 4  ;;  %s566_s1 = int_to_ptr.hbm [resolvable:$true] %s565_s1 }
   0xb   :  { %v58_v47 = vperm.slane %v29_v41, 0  ;;  %v728_v50 = vmov 13   ;;  %v104_v52 = vperm.slane %v29_v41, 2  ;;  %v129_v60 = vperm.slane %v29_v41, 3  ;;  %v166_v41 = vld [vmem:[%s928_s3] sm:$0xff] }
   0xc   :  { %v729_v62 = vmov 17   ;;  %vm194_vm0 = vcmask 261120  }
   0xd   :  { %629 = vset.pattern.permute.xlu0 %v712_v7  ;;  %68 = vperm.xlu2 %624, %v31_v6  }
   0xe   :  { %101 = vperm.xlu0 %629, %v33_v5  }
   0xf   :  { %55 = vperm.xlu1 %623, %v33_v5  }
  0x15   :  { %627 = vset.pattern.permute.xlu2 %v712_v7 }
  0x16   :  { %630 = vset.pattern.permute.xlu0 %v711_v4  ;;  %89 = vperm.xlu2 %627, %v30_v2  }
  0x17   :  { %626 = vset.pattern.permute.xlu1 %v710_v3  ;;  %40 = vperm.xlu0 %630, %v30_v2  }
  0x18   :  { %76 = vperm.xlu1 %626, %v33_v5  }
  0x1e   :  { %97 = vperm.xlu2 %627, %v32_v1  }
  0x1f   :  { %45 = vperm.xlu0 %630, %v31_v6  }
  0x20   :  { %628 = vset.pattern.permute.xlu1 %v712_v7 }
  0x21   :  { %93 = vperm.xlu1 %628, %v31_v6  }
  0x26   :  { %632 = vset.pattern.permute.xlu2 %v713_v9 }
  0x27   :  { %155 = vperm.xlu0 %630, %v37_v8   ;;  %118 = vperm.xlu2 %632, %v31_v6  }
  0x29   :  { %631 = vset.pattern.permute.xlu1 %v713_v9 }
  0x2a   :  { %114 = vperm.xlu1 %631, %v30_v2  }
  0x2f   :  { %181 = vperm.xlu0 %630, %v171_v10   ;;  %122 = vperm.xlu2 %632, %v32_v1   ;;  %v730_v1 = vmov 24  }
  0x32   :  { %126 = vperm.xlu1 %631, %v33_v5  }
  0x37   :  { %244 = vperm.xlu0 %630, %v809_v11   ;;  %634 = vset.pattern.permute.xlu2 %v711_v4 }
  0x38   :  { %145 = vperm.xlu2 %634, %v35_v12  }
  0x3a   :  { %633 = vset.pattern.permute.xlu1 %v711_v4 }
  0x3b   :  { %150 = vperm.xlu1 %633, %v36_v13  }
  0x3f   :  { %637 = vset.pattern.permute.xlu0 %v713_v9  ;;  %v731_v9 = vmov 18  }
  0x40   :  { %176 = vperm.xlu2 %634, %v170_v14   ;;  %270 = vperm.xlu0 %637, %v809_v11  }
  0x43   :  { %140 = vperm.xlu1 %633, %v34_v15  }
  0x48   :  { %191 = vperm.xlu2 %634, %v173_v16   ;;  %642 = vset.pattern.permute.xlu0 %v725_v40 }
  0x49   :  { %320 = vperm.xlu0 %642, %v809_v11  }
  0x4b   :  { %186 = vperm.xlu1 %633, %v172_v17  }
  0x50   :  { %636 = vset.pattern.permute.xlu2 %v712_v7 }
  0x51   :  { %260 = vperm.xlu2 %636, %v809_v11   ;;  %647 = vset.pattern.permute.xlu0 %v728_v50 }
  0x52   :  { %367 = vperm.xlu0 %647, %v809_v11  }
  0x53   :  { %635 = vset.pattern.permute.xlu1 %v710_v3 }
  0x54   :  { %250 = vperm.xlu1 %635, %v809_v11  }
  0x59   :  { %639 = vset.pattern.permute.xlu2 %v717_v22  ;;  %v732_v22 = vmov 20  }
  0x5a   :  { %290 = vperm.xlu2 %639, %v809_v11   ;;  %652 = vset.pattern.permute.xlu0 %v731_v9 }
  0x5b   :  { %414 = vperm.xlu0 %652, %v809_v11  }
  0x5c   :  { %638 = vset.pattern.permute.xlu1 %v714_v18 }
  0x5d   :  { %280 = vperm.xlu1 %638, %v809_v11  }
  0x5f   :  { %v838_v21 = vpop.permute.xlu2 %64 }
  0x62   :  { %641 = vset.pattern.permute.xlu2 %v719_v26 }
  0x63   :  { %310 = vperm.xlu2 %641, %v809_v11  }
  0x65   :  { %640 = vset.pattern.permute.xlu1 %v715_v19  ;;  %v80_v19 = vmul.f32 %v79_v44, %v838_v21 }
  0x66   :  { %300 = vperm.xlu1 %640, %v809_v11  }
  0x67   :  { %v69_v25 = vpop.permute.xlu2 %68 }
  0x68   :  { %v81_v54 = vmul.f32 %v79_v44, %v69_v25 }
  0x6b   :  { %644 = vset.pattern.permute.xlu2 %v721_v32 }
  0x6c   :  { %337 = vperm.xlu2 %644, %v809_v11  }
  0x6e   :  { %643 = vset.pattern.permute.xlu1 %v716_v20 }
  0x6f   :  { %327 = vperm.xlu1 %643, %v809_v11  }
  0x70   :  { %v844_v30 = vpop.permute.xlu2 %89 }
  0x71   :  { %v105_v25 = vmul.f32 %v104_v52, %v844_v30 }
  0x74   :  { %646 = vset.pattern.permute.xlu2 %v723_v36 }
  0x75   :  { %357 = vperm.xlu2 %646, %v809_v11  }
  0x77   :  { %645 = vset.pattern.permute.xlu1 %v718_v23  ;;  %v73_v27 = vpop.permute.xlu0 %72 }
  0x78   :  { %347 = vperm.xlu1 %645, %v809_v11   ;;  %v98_v35 = vpop.permute.xlu2 %97  ;;  %v82_v57 = vmul.f32 %v79_v44, %v73_v27 }
  0x79   :  { %v51_v24 = vpop.permute.xlu1 %50  ;;  %v107_v6 = vmul.f32 %v104_v52, %v98_v35 }
  0x7a   :  { %v61_v58 = vmul.f32 %v58_v47, %v51_v24  ;;  %v733_v24 = vmov 26  }
  0x7c   :  { %v86_v5 = vadd.f32 %v82_v57, %v61_v58 }
  0x7d   :  { %649 = vset.pattern.permute.xlu2 %v726_v43  ;;  %v738_v43 = vmov 25  }
  0x7e   :  { %387 = vperm.xlu2 %649, %v809_v11   ;;  %v111_v15 = vadd.f32 %v107_v6, %v86_v5 }
  0x80   :  { %648 = vset.pattern.permute.xlu1 %v720_v29  ;;  %v102_v31 = vpop.permute.xlu0 %101  ;;  %v734_v29 = vmov 23  }
  0x81   :  { %v56_v28 = vpop.permute.xlu1 %55  ;;  %377 = vperm.xlu1 %648, %v809_v11   ;;  %v119_v42 = vpop.permute.xlu2 %118  ;;  %v108_v55 = vmul.f32 %v104_v52, %v102_v31  ;;  %657 = vset.pattern.permute.xlu0 %v734_v29 }
  0x82   :  { %v62_v53 = vmul.f32 %v58_v47, %v56_v28  ;;  %v131_v7 = vmul.f32 %v129_v60, %v119_v42  ;;  %464 = vperm.xlu0 %657, %v809_v11   ;;  %v167_v42 = vld [vmem:[%s928_s3 + $0x8] sm:$0xff] }
  0x86   :  { %651 = vset.pattern.permute.xlu2 %v729_v62 }
  0x87   :  { %404 = vperm.xlu2 %651, %v809_v11  }
  0x89   :  { %650 = vset.pattern.permute.xlu1 %v722_v34  ;;  %v41_v37 = vpop.permute.xlu0 %40  ;;  %v123_v61 = vpop.permute.xlu2 %122  ;;  %v735_v34 = vmov 22  }
  0x8a   :  { %v77_v33 = vpop.permute.xlu1 %76  ;;  %397 = vperm.xlu1 %650, %v809_v11   ;;  %v132_v12 = vmul.f32 %v129_v60, %v123_v61  ;;  %v59_v16 = vmul.f32 %v58_v47, %v41_v37  ;;  %v736_v37 = vmov 29  }
  0x8b   :  { %v83_v49 = vmul.f32 %v79_v44, %v77_v33  ;;  %v168_v44 = vld [vmem:[%s928_s3 + $0x10] sm:$0xff] }
  0x8c   :  { %v136_v20 = vadd.f32 %v132_v12, %v111_v15  ;;  %v84_v26 = vadd.f32 %v80_v19, %v59_v16 }
  0x8d   :  { %v87_v56 = vadd.f32 %v83_v49, %v62_v53  ;;  %v241_v49 = vld [vmem:[#allocation2] sm:$0x1] }
  0x8e   :  { %v109_v32 = vadd.f32 %v105_v25, %v84_v26 }
  0x8f   :  { %v112_v2 = vadd.f32 %v108_v55, %v87_v56  ;;  %654 = vset.pattern.permute.xlu2 %v732_v22 }
  0x90   :  { %434 = vperm.xlu2 %654, %v809_v11  }
  0x91   :  { %v46_v45 = vpop.permute.xlu0 %45 }
  0x92   :  { %653 = vset.pattern.permute.xlu1 %v724_v39  ;;  %v60_v51 = vmul.f32 %v58_v47, %v46_v45  ;;  %v146_v18 = vpop.permute.xlu2 %145  ;;  %v737_v39 = vmov 28   ;;  %v169_v45 = vld [vmem:[%s928_s3 + $0x18] sm:$0xff]  ;;  %v740_v47 = vmov 27   ;;  %s742_s3 = smov [#allocation3]  }
  0x93   :  { %v94_v38 = vpop.permute.xlu1 %93  ;;  %424 = vperm.xlu1 %653, %v809_v11   ;;  %662 = vset.pattern.permute.xlu0 %v737_v39  ;;  %s563_s9 = sshll.u32 %s742_s3, 4  ;;  %s564_s9 = int_to_ptr.vmem [resolvable:$true] %s563_s9 }
  0x94   :  { %v85_v59 = vadd.f32 %v81_v54, %v60_v51  ;;  %v106_v63 = vmul.f32 %v104_v52, %v94_v38  ;;  %511 = vperm.xlu0 %662, %v809_v11  }
  0x96   :  { %v110_v8 = vadd.f32 %v106_v63, %v85_v59 }
  0x98   :  { %v135_v17 = vadd.f32 %v131_v7, %v110_v8  ;;  %656 = vset.pattern.permute.xlu2 %v735_v34 }
  0x99   :  { %v156_v13 = vpop.permute.xlu0 %155  ;;  %454 = vperm.xlu2 %656, %v809_v11  }
  0x9a   :  { %v159_v27 = vadd.f32 %v146_v18, %v135_v17  ;;  %v177_v50 = vpop.permute.xlu2 %176 }
  0x9b   :  { %655 = vset.pattern.permute.xlu1 %v727_v46  ;;  %v739_v46 = vmov 31  }
  0x9c   :  { %v115_v48 = vpop.permute.xlu1 %114  ;;  %444 = vperm.xlu1 %655, %v809_v11   ;;  %667 = vset.pattern.permute.xlu0 %v711_v4 }
  0x9d   :  { %v130_v31 = vmul.f32 %v129_v60, %v115_v48  ;;  %v741_v48 = vmov 30  }
  0x9f   :  { %v134_v33 = vadd.f32 %v130_v31, %v109_v32 }
  0xa1   :  { %659 = vset.pattern.permute.xlu2 %v738_v43 }
  0xa2   :  { %481 = vperm.xlu2 %659, %v809_v11   ;;  %v888_v52 = vpop.permute.xlu2 %191 }
  0xa4   :  { %v127_v0 = vpop.permute.xlu1 %126  ;;  %658 = vset.pattern.permute.xlu1 %v730_v1 }
  0xa5   :  { %v133_v3 = vmul.f32 %v129_v60, %v127_v0  ;;  %474 = vperm.xlu1 %658, %v809_v11  }
  0xa7   :  { %v137_v10 = vadd.f32 %v133_v3, %v112_v2 }
  0xa9   :  { %v161_v14 = vadd.f32 %v156_v13, %v137_v10 }
  0xaa   :  { %661 = vset.pattern.permute.xlu2 %v740_v47 }
  0xab   :  { %668 = vtanh.f32 %v161_v14  ;;  %501 = vperm.xlu2 %661, %v809_v11   ;;  %v261_v54 = vpop.permute.xlu2 %260 }
  0xac   :  { %v263_v7 = vperm.slane %v261_v54, 0 }
  0xad   :  { %v151_v23 = vpop.permute.xlu1 %150  ;;  %660 = vset.pattern.permute.xlu1 %v733_v24 }
  0xae   :  { %v160_v28 = vadd.f32 %v151_v23, %v136_v20  ;;  %491 = vperm.xlu1 %660, %v809_v11  }
  0xb0   :  { %670 = vtanh.f32 %v160_v28 }
  0xb1   :  { %v669_v21 = vpop.eup %668  ;;  %672 = vtanh.f32 %v159_v27 }
  0xb2   :  { %219 = vmatpush.msra.mxu0 %v669_v21  ;;  %578 = vmatpush.msra.mxu1 %v669_v21 }
  0xb3   :  { %579 = vmatpush.msra.mxu2 %v669_v21  ;;  %580 = vmatpush.msra.mxu3 %v669_v21 }
  0xb4   :  { %664 = vset.pattern.permute.xlu2 %v741_v48  ;;  %v291_v56 = vpop.permute.xlu2 %290 }
  0xb5   :  { %v141_v30 = vpop.permute.xlu1 %140  ;;  %531 = vperm.xlu2 %664, %v809_v11   ;;  %v293_v23 = vperm.slane %v291_v56, 0 }
  0xb6   :  { %v671_v35 = vpop.eup %670  ;;  %v158_v36 = vadd.f32 %v141_v30, %v134_v33  ;;  %663 = vset.pattern.permute.xlu1 %v736_v37 }
  0xb7   :  { %220 = vmatpush.msra.mxu0 %v671_v35  ;;  %581 = vmatpush.msra.mxu1 %v671_v35  ;;  %v673_v38 = vpop.eup %672 }
  0xb8   :  { %674 = vtanh.f32 %v158_v36  ;;  %582 = vmatpush.msra.mxu2 %v671_v35  ;;  %583 = vmatpush.msra.mxu3 %v671_v35 }
  0xb9   :  { %221 = vmatpush.msra.mxu0 %v673_v38  ;;  %584 = vmatpush.msra.mxu1 %v673_v38 }
  0xba   :  { %585 = vmatpush.msra.mxu2 %v673_v38  ;;  %586 = vmatpush.msra.mxu3 %v673_v38 }
  0xbb   :  { %521 = vperm.xlu1 %663, %v809_v11  }
  0xbd   :  { %666 = vset.pattern.permute.xlu2 %v711_v4  ;;  %v886_v51 = vpop.permute.xlu1 %186  ;;  %v311_v58 = vpop.permute.xlu2 %310 }
  0xbe   :  { %v675_v40 = vpop.eup %674  ;;  %552 = vperm.xlu2 %666, %v241_v49   ;;  %v313_v32 = vperm.slane %v311_v58, 0 }
  0xbf   :  { %222 = vmatpush.msra.mxu0 %v675_v40  ;;  %587 = vmatpush.msra.mxu1 %v675_v40 }
  0xc0   :  { %588 = vmatpush.msra.mxu2 %v675_v40  ;;  %589 = vmatpush.msra.mxu3 %v675_v40 }
  0xc1   :  { %574 = vmatmul.msk.f32.vlgmr.msra.gmra.mxu0 %vm194_vm0, %v166_v41  ;;  %575 = vmatmul.msk.f32.vlgmr.msra.gmra.mxu1 %vm194_vm0, %v167_v42 }
  0xc2   :  { %576 = vmatmul.msk.f32.vlgmr.msra.gmra.mxu2 %vm194_vm0, %v168_v44  ;;  %577 = vmatmul.msk.f32.vlgmr.msra.gmra.mxu3 %vm194_vm0, %v169_v45 }
  0xc3   :  { %665 = vset.pattern.permute.xlu1 %v739_v46 }
  0xc4   :  { %541 = vperm.xlu1 %665, %v809_v11   ;;  %v182_v11 = vpop.permute.xlu0 %181 }
  0xc6   :  { %v251_v53 = vpop.permute.xlu1 %250  ;;  %v338_v60 = vpop.permute.xlu2 %337 }
  0xc7   :  { %v253_v6 = vperm.slane %v251_v53, 0  ;;  %v340_v45 = vperm.slane %v338_v60, 0 }
  0xcc   :  { %v245_v63 = vpop.permute.xlu0 %244 }
  0xcd   :  { %v247_v13 = vperm.slane %v245_v63, 0 }
  0xcf   :  { %v281_v55 = vpop.permute.xlu1 %280  ;;  %v892_v62 = vpop.permute.xlu2 %357 }
  0xd0   :  { %v283_v18 = vperm.slane %v281_v55, 0 }
  0xd4   :  { %v271_v5 = vpop.permute.xlu0 %270 }
  0xd5   :  { %v273_v8 = vperm.slane %v271_v5, 0 }
  0xd8   :  { %v301_v57 = vpop.permute.xlu1 %300  ;;  %v896_v0 = vpop.permute.xlu2 %387 }
  0xd9   :  { %v303_v28 = vperm.slane %v301_v57, 0  ;;  %v360_v57 = vperm.slane %v892_v62, 0 }
  0xdc   :  { %v321_v27 = vpop.permute.xlu0 %320 }
  0xdd   :  { %v323_v42 = vperm.slane %v321_v27, 0 }
  0xe1   :  { %v328_v59 = vpop.permute.xlu1 %327  ;;  %v900_v12 = vpop.permute.xlu2 %404 }
  0xe2   :  { %v330_v41 = vperm.slane %v328_v59, 0 }
  0xea   :  { %v890_v61 = vpop.permute.xlu1 %347  ;;  %v904_v35 = vpop.permute.xlu2 %434 }
  0xeb   :  { %v350_v53 = vperm.slane %v890_v61, 0  ;;  %v390_v61 = vperm.slane %v896_v0, 0 }
  0xf3   :  { %v894_v4 = vpop.permute.xlu1 %377 }
  0xfc   :  { %v898_v2 = vpop.permute.xlu1 %397 }
 0x105   :  { %v902_v16 = vpop.permute.xlu1 %424 }
 0x106   :  { %v427_v0 = vperm.slane %v902_v16, 0 }
 0x10e   :  { %v906_v40 = vpop.permute.xlu1 %444 }
 0x13e   :  { %v224_v1 = vpop.f32.mrf.mxu0  ;;  %v227_v9 = vpop.f32.mrf.mxu1 }
 0x13f   :  { %v225_v3 = vadd.f32 %v224_v1, %v177_v50  ;;  %v228_v17 = vadd.f32 %v227_v9, %v182_v11  ;;  %v368_v50 = vpop.permute.xlu0 %367 }
 0x140   :  { %v370_v11 = vperm.slane %v368_v50, 0 }
 0x141   :  { %676 = vtanh.f32 %v225_v3  ;;  %v455_v3 = vpop.permute.xlu2 %454 }
 0x142   :  { %678 = vtanh.f32 %v228_v17  ;;  %v407_v17 = vperm.slane %v900_v12, 0 }
 0x145   :  { %v230_v46 = vpop.f32.mrf.mxu2  ;;  %v233_v27 = vpop.f32.mrf.mxu3 }
 0x146   :  { %v231_v58 = vadd.f32 %v230_v46, %v886_v51 }
 0x147   :  { %v677_v10 = vpop.eup %676 }
 0x148   :  { %v254_v14 = vmul.f32 %v677_v10, %v253_v6  ;;  %v264_v15 = vmul.f32 %v677_v10, %v263_v7  ;;  %v248_v19 = vmul.f32 %v677_v10, %v247_v13  ;;  %v274_v22 = vmul.f32 %v677_v10, %v273_v8  ;;  %v679_v39 = vpop.eup %678  ;;  %v912_v8 = vpop.permute.xlu1 %474 }
 0x149   :  { %v284_v26 = vmul.f32 %v677_v10, %v283_v18  ;;  %v294_v21 = vmul.f32 %v677_v10, %v293_v23  ;;  %v304_v34 = vmul.f32 %v677_v10, %v303_v28  ;;  %v314_v38 = vmul.f32 %v677_v10, %v313_v32 }
 0x14a   :  { %v256_v20 = vrot.slane %v254_v14, 1  ;;  %v266_v25 = vrot.slane %v264_v15, 2  ;;  %v276_v31 = vrot.slane %v274_v22, 3  ;;  %v331_v49 = vmul.f32 %v679_v39, %v330_v41  ;;  %v415_v15 = vpop.permute.xlu0 %414 }
 0x14b   :  { %v286_v30 = vrot.slane %v284_v26, 4  ;;  %v296_v37 = vrot.slane %v294_v21, 5  ;;  %v306_v44 = vrot.slane %v304_v34, 6  ;;  %v316_v48 = vrot.slane %v314_v38, 7  ;;  %v482_v26 = vpop.permute.xlu2 %481 }
 0x14c   :  { %v258_v24 = vadd.f32 %v256_v20, %v248_v19  ;;  %v324_v55 = vmul.f32 %v679_v39, %v323_v42  ;;  %v341_v56 = vmul.f32 %v679_v39, %v340_v45  ;;  %v333_v63 = vrot.slane %v331_v49, 1 }
 0x14d   :  { %v351_v1 = vmul.f32 %v679_v39, %v350_v53  ;;  %v361_v6 = vmul.f32 %v679_v39, %v360_v57  ;;  %v380_v7 = vperm.slane %v894_v4, 0  ;;  %680 = vtanh.f32 %v231_v58 }
 0x14e   :  { %v268_v29 = vadd.f32 %v266_v25, %v258_v24  ;;  %v343_v5 = vrot.slane %v341_v56, 2  ;;  %v371_v62 = vmul.f32 %v679_v39, %v370_v11  ;;  %v391_v20 = vmul.f32 %v679_v39, %v390_v61 }
 0x14f   :  { %v353_v10 = vrot.slane %v351_v1, 3  ;;  %v363_v51 = vrot.slane %v361_v6, 4  ;;  %v381_v14 = vmul.f32 %v679_v39, %v380_v7  ;;  %v400_v4 = vperm.slane %v898_v2, 0 }
 0x150   :  { %v278_v33 = vadd.f32 %v276_v31, %v268_v29  ;;  %v373_v19 = vrot.slane %v371_v62, 5  ;;  %v417_v23 = vperm.slane %v415_v15, 0  ;;  %v393_v29 = vrot.slane %v391_v20, 7  ;;  %v492_v21 = vpop.permute.xlu1 %491 }
 0x151   :  { %v383_v25 = vrot.slane %v381_v14, 6  ;;  %v437_v32 = vperm.slane %v904_v35, 0  ;;  %v234_v34 = vadd.f32 %v233_v27, %v888_v52  ;;  %v447_v2 = vperm.slane %v906_v40, 0 }
 0x152   :  { %v288_v36 = vadd.f32 %v286_v30, %v278_v33  ;;  %v465_v39 = vpop.permute.xlu0 %464  ;;  %v457_v41 = vperm.slane %v455_v3, 0  ;;  %v484_v53 = vperm.slane %v482_v26, 0  ;;  %v477_v57 = vperm.slane %v912_v8, 0 }
 0x153   :  { %v681_v22 = vpop.eup %680  ;;  %682 = vtanh.f32 %v234_v34  ;;  %v494_v58 = vperm.slane %v492_v21, 0 }
 0x154   :  { %v298_v43 = vadd.f32 %v296_v37, %v288_v36  ;;  %v408_v31 = vmul.f32 %v681_v22, %v407_v17  ;;  %v401_v33 = vmul.f32 %v681_v22, %v400_v4  ;;  %v418_v30 = vmul.f32 %v681_v22, %v417_v23 }
 0x155   :  { %v428_v38 = vmul.f32 %v681_v22, %v427_v0  ;;  %v448_v35 = vmul.f32 %v681_v22, %v447_v2  ;;  %v458_v50 = vmul.f32 %v681_v22, %v457_v41 }
 0x156   :  { %v308_v47 = vadd.f32 %v306_v44, %v298_v43  ;;  %v410_v37 = vrot.slane %v408_v31, 1  ;;  %v420_v42 = vrot.slane %v418_v30, 2  ;;  %v438_v43 = vmul.f32 %v681_v22, %v437_v32 }
 0x157   :  { %v467_v44 = vperm.slane %v465_v39, 0  ;;  %v430_v46 = vrot.slane %v428_v38, 3 }
 0x158   :  { %v318_v54 = vadd.f32 %v316_v48, %v308_v47  ;;  %v502_v47 = vpop.permute.xlu2 %501  ;;  %v440_v49 = vrot.slane %v438_v43, 4  ;;  %v522_v52 = vpop.permute.xlu1 %521 }
 0x159   :  { %v683_v56 = vpop.eup %682  ;;  %v504_v1 = vperm.slane %v502_v47, 0  ;;  %v524_v62 = vperm.slane %v522_v52, 0 }
 0x15a   :  { %v325_v59 = vadd.f32 %v324_v55, %v318_v54  ;;  %v450_v54 = vrot.slane %v448_v35, 5  ;;  %v468_v55 = vmul.f32 %v681_v22, %v467_v44  ;;  %v478_v7 = vmul.f32 %v683_v56, %v477_v57 }
 0x15b   :  { %v495_v61 = vmul.f32 %v683_v56, %v494_v58  ;;  %v505_v14 = vmul.f32 %v683_v56, %v504_v1  ;;  %v525_v23 = vmul.f32 %v683_v56, %v524_v62 }
 0x15c   :  { %v335_v60 = vadd.f32 %v333_v63, %v325_v59  ;;  %v460_v59 = vrot.slane %v458_v50, 6  ;;  %v512_v63 = vpop.permute.xlu0 %511 }
 0x15d   :  { %v497_v8 = vrot.slane %v495_v61, 2  ;;  %v507_v4 = vrot.slane %v505_v14, 3 }
 0x15e   :  { %v345_v9 = vadd.f32 %v343_v5, %v335_v60  ;;  %v470_v60 = vrot.slane %v468_v55, 7  ;;  %v485_v5 = vmul.f32 %v683_v56, %v484_v53 }
 0x160   :  { %v355_v13 = vadd.f32 %v353_v10, %v345_v9  ;;  %v514_v9 = vperm.slane %v512_v63, 0  ;;  %v532_v10 = vpop.permute.xlu2 %531  ;;  %v542_v15 = vpop.permute.xlu1 %541 }
 0x161   :  { %v544_v20 = vperm.slane %v542_v15, 0 }
 0x162   :  { %v365_v18 = vadd.f32 %v363_v51, %v355_v13  ;;  %v487_v51 = vrot.slane %v485_v5, 1 }
 0x163   :  { %v545_v0 = vmul.f32 %v683_v56, %v544_v20 }
 0x164   :  { %v375_v24 = vadd.f32 %v373_v19, %v365_v18  ;;  %v515_v18 = vmul.f32 %v683_v56, %v514_v9  ;;  %v534_v19 = vperm.slane %v532_v10, 0 }
 0x165   :  { %v547_v32 = vrot.slane %v545_v0, 7 }
 0x166   :  { %v385_v28 = vadd.f32 %v383_v25, %v375_v24  ;;  %v517_v25 = vrot.slane %v515_v18, 4  ;;  %v535_v26 = vmul.f32 %v683_v56, %v534_v19 }
 0x168   :  { %v395_v12 = vadd.f32 %v393_v29, %v385_v28  ;;  %v527_v28 = vrot.slane %v525_v23, 5  ;;  %v553_v29 = vpop.permute.xlu2 %552  ;;  %v537_v21 = vrot.slane %v535_v26, 6 }
 0x16a   :  { %v402_v36 = vadd.f32 %v401_v33, %v395_v12  ;;  %v555_v33 = vperm.slane %v553_v29, 0 }
 0x16c   :  { %v412_v16 = vadd.f32 %v410_v37, %v402_v36 }
 0x16e   :  { %v422_v45 = vadd.f32 %v420_v42, %v412_v16 }
 0x170   :  { %v432_v48 = vadd.f32 %v430_v46, %v422_v45 }
 0x172   :  { %v442_v40 = vadd.f32 %v440_v49, %v432_v48 }
 0x174   :  { %v452_v11 = vadd.f32 %v450_v54, %v442_v40 }
 0x176   :  { %v462_v3 = vadd.f32 %v460_v59, %v452_v11 }
 0x178   :  { %v472_v6 = vadd.f32 %v470_v60, %v462_v3 }
 0x17a   :  { %v479_v13 = vadd.f32 %v478_v7, %v472_v6 }
 0x17c   :  { %v489_v17 = vadd.f32 %v487_v51, %v479_v13 }
 0x17e   :  { %v499_v22 = vadd.f32 %v497_v8, %v489_v17 }
 0x180   :  { %v509_v24 = vadd.f32 %v507_v4, %v499_v22 }
 0x182   :  { %v519_v27 = vadd.f32 %v517_v25, %v509_v24 }
 0x184   :  { %v529_v31 = vadd.f32 %v527_v28, %v519_v27 }
 0x186   :  { %v539_v12 = vadd.f32 %v537_v21, %v529_v31 }
 0x188   :  { %v549_v30 = vadd.f32 %v547_v32, %v539_v12 }
 0x18a   :  { %v556_v34 = vadd.f32 %v555_v33, %v549_v30 }
 0x18c   :  { %557 = vst [vmem:[#allocation3] sm:$0x1] %v556_v34 }
 0x18d   :  { %568 = dma.vmem_to_hbm [thread:$0]  %s564_s9, 16, %s566_s1, [#allocation4]  }
 0x18e   :  { %708 = dma.done.wait [#allocation4], 16  }
 0x18f   :  { %709 = vsyncadd [#allocation4], 4294967280 }
 0x190   :  { %573 = vsyncpa [#allocation4], 1 }

</bundles_post_ra>
